<compile_context>
chip_gen: v6e
topology: v6e:2x2x1
jax: 0.10.0
libtpu: 0.0.40
codegen_flags: <defaults>
</compile_context>

<pallas_src>
import jax
import jax.numpy as jnp
from jax.experimental import pallas as pl
from jax.experimental.pallas import tpu as pltpu

HIDDEN = 64
LANE = 128       # vreg lane width: hidden dims padded to this
SUBLANE = 8      # vreg sublane width: batch rounded up to this
MAX_TB = 2048    # max batch-tile rows (a few MiB of VMEM incl. intermediates)


def _round_up(n, m):
    return ((n + m - 1) // m) * m


def qnet_kernel(x_ref, w1_ref, w2_ref, w3_ref, b_ref, o_ref):
    out_w = o_ref.shape[-1]
    # Biases packed as rows 0/1/2 of one lane-dense (3, 128) buffer.
    b1 = b_ref[0:1, :]
    b2 = b_ref[1:2, :]
    b3 = b_ref[2:3, 0:out_w]
    # fc1 + relu : (tb, in) @ (in, 128)
    h1 = jnp.dot(x_ref[...], w1_ref[...], preferred_element_type=jnp.float32)
    h1 = jnp.maximum(h1 + b1, 0.0)
    # fc2 + relu : (tb, 128) @ (128, 128)
    h2 = jnp.dot(h1, w2_ref[...], preferred_element_type=jnp.float32)
    h2 = jnp.maximum(h2 + b2, 0.0)
    # fc3 (no activation) : (tb, 128) @ (128, out_size) -> narrow store
    out = jnp.dot(h2, w3_ref[...], preferred_element_type=jnp.float32)
    o_ref[...] = (out + b3).astype(o_ref.dtype)


def qnetwork_forward(x, packed):
    """x: (B, input_size) float32. packed: params from pack_params."""
    w1p, w2p, w3p, bp = packed["w1"], packed["w2"], packed["w3"], packed["b"]
    out_size = packed["out_size"]
    B, in_features = x.shape
    assert in_features == w1p.shape[0], "x feature dim must match packed w1 K dim"

    # Batch tiling: tiles up to MAX_TB rows, and at least 2 grid steps whenever
    # the padded batch has >= 2*SUBLANE rows (v7x megacore; no-op on v5e/v6e).
    b8 = _round_up(max(B, SUBLANE), SUBLANE)
    if b8 >= 2 * SUBLANE:
        tb = min(MAX_TB, _round_up((b8 + 1) // 2, SUBLANE))
    else:
        tb = b8
    b_pad = _round_up(b8, tb)

    # Pad along batch only (padded rows produce junk output; sliced off below).
    xp = x.astype(jnp.float32)
    if b_pad != B:
        xp = jnp.zeros((b_pad, in_features), jnp.float32).at[:B, :].set(xp)

    out = pl.pallas_call(
        qnet_kernel,
        out_shape=jax.ShapeDtypeStruct((b_pad, out_size), jnp.float32),
        grid=(b_pad // tb,),
        in_specs=[
            pl.BlockSpec((tb, in_features), lambda i: (i, 0)),  # x: batch-tiled, unpadded lanes
            pl.BlockSpec(w1p.shape, lambda i: (0, 0)),          # weights resident in VMEM
            pl.BlockSpec(w2p.shape, lambda i: (0, 0)),
            pl.BlockSpec(w3p.shape, lambda i: (0, 0)),
            pl.BlockSpec(bp.shape, lambda i: (0, 0)),           # packed biases
        ],
        out_specs=pl.BlockSpec((tb, out_size), lambda i: (i, 0)),
        compiler_params=pltpu.CompilerParams(
            dimension_semantics=("parallel",)),                 # v7x megacore split
    )(xp, w1p, w2p, w3p, bp)

    if b_pad != B:
        out = out[:B]     # padded batch rows are junk; never reuse them
    return out


def init_params(key, input_size, output_size):
    """Deterministic synthetic init (torch-Linear-style uniform bounds), unpadded."""
    ks = jax.random.split(key, 6)

    def linear(kw, kb, fan_in, fan_out):
        bound = 1.0 / jnp.sqrt(jnp.float32(fan_in))
        w = jax.random.uniform(kw, (fan_in, fan_out), jnp.float32, -bound, bound)
        b = jax.random.uniform(kb, (1, fan_out), jnp.float32, -bound, bound)
        return w, b

    w1, b1 = linear(ks[0], ks[1], input_size, HIDDEN)
    w2, b2 = linear(ks[2], ks[3], HIDDEN, HIDDEN)
    w3, b3 = linear(ks[4], ks[5], HIDDEN, output_size)
    return {"w1": w1, "b1": b1, "w2": w2, "b2": b2, "w3": w3, "b3": b3}


def pack_params(p, input_size, output_size):
    """Pad hidden dims to 128 lanes (zeros -> exact math); keep input/output dims narrow."""
    w1p = jnp.zeros((input_size, LANE), jnp.float32).at[:, :HIDDEN].set(p["w1"])
    w2p = jnp.zeros((LANE, LANE), jnp.float32).at[:HIDDEN, :HIDDEN].set(p["w2"])
    w3p = jnp.zeros((LANE, output_size), jnp.float32).at[:HIDDEN, :].set(p["w3"])
    bp = jnp.zeros((3, LANE), jnp.float32)
    bp = bp.at[0, :HIDDEN].set(p["b1"][0])
    bp = bp.at[1, :HIDDEN].set(p["b2"][0])
    bp = bp.at[2, :output_size].set(p["b3"][0])
    return {"w1": w1p, "w2": w2p, "w3": w3p, "b": bp, "out_size": output_size}


def reference_forward(x, p):
    h1 = jnp.maximum(x @ p["w1"] + p["b1"], 0.0)
    h2 = jnp.maximum(h1 @ p["w2"] + p["b2"], 0.0)
    return h2 @ p["w3"] + p["b3"]


if __name__ == "__main__":
    key = jax.random.PRNGKey(0)
    k_params, k_x1, k_x2 = jax.random.split(key, 3)

    input_size = 16   # e.g. state dimension
    output_size = 4   # e.g. number of actions

    params = init_params(k_params, input_size, output_size)
    packed = pack_params(params, input_size, output_size)

    # Small RL-style batch (single minimal grid step).
    x_small = jax.random.normal(k_x1, (8, input_size), jnp.float32)
    out_small = jax.block_until_ready(qnetwork_forward(x_small, packed))
    ref_small = reference_forward(x_small, params)
    assert out_small.shape == (8, output_size)
    assert jnp.allclose(out_small, ref_small, atol=1e-4, rtol=1e-4)

    # Larger batch: exercises the batch grid (2 steps, ragged tail padding).
    x_big = jax.random.normal(k_x2, (1000, input_size), jnp.float32)
    out_big = jax.block_until_ready(qnetwork_forward(x_big, packed))
    ref_big = reference_forward(x_big, params)
    assert out_big.shape == (1000, output_size)
    assert jnp.allclose(out_big, ref_big, atol=1e-4, rtol=1e-4)

    print("KERNEL_OK")
</pallas_src>

<mosaic_0001>
module attributes {stable_mosaic.version = 11 : i64} {
  func.func @qnet_kernel(%arg0: i32, %arg1: memref<8x16xf32, #tpu.memory_space<vmem>>, %arg2: memref<16x128xf32, #tpu.memory_space<vmem>>, %arg3: memref<128x128xf32, #tpu.memory_space<vmem>>, %arg4: memref<128x4xf32, #tpu.memory_space<vmem>>, %arg5: memref<3x128xf32, #tpu.memory_space<vmem>>, %arg6: memref<8x4xf32, #tpu.memory_space<vmem>>) attributes {dimension_semantics = [#tpu.dimension_semantics<parallel>], iteration_bounds = array<i64: 1>, scalar_prefetch = 0 : i64, scratch_operands = 0 : i64, tpu.core_type = #tpu.core_type<tc>, window_params = [{transform_indices = @transform_0, window_bounds = array<i64: 8, 16>}, {pipeline_mode = #tpu.pipeline_mode<synchronous>, transform_indices = @transform_1, window_bounds = array<i64: 16, 128>}, {pipeline_mode = #tpu.pipeline_mode<synchronous>, transform_indices = @transform_2, window_bounds = array<i64: 128, 128>}, {pipeline_mode = #tpu.pipeline_mode<synchronous>, transform_indices = @transform_3, window_bounds = array<i64: 128, 4>}, {pipeline_mode = #tpu.pipeline_mode<synchronous>, transform_indices = @transform_4, window_bounds = array<i64: 3, 128>}, {transform_indices = @transform_5, window_bounds = array<i64: 8, 4>}]} {
    %c0 = arith.constant 0 : index
    %c0_0 = arith.constant 0 : index
    %0 = vector.load %arg5[%c0, %c0_0] : memref<3x128xf32, #tpu.memory_space<vmem>>, vector<1x128xf32>
    %c1 = arith.constant 1 : index
    %c0_1 = arith.constant 0 : index
    %1 = vector.load %arg5[%c1, %c0_1] : memref<3x128xf32, #tpu.memory_space<vmem>>, vector<1x128xf32>
    %c2 = arith.constant 2 : index
    %c0_2 = arith.constant 0 : index
    %2 = vector.load %arg5[%c2, %c0_2] : memref<3x128xf32, #tpu.memory_space<vmem>>, vector<1x4xf32>
    %c0_3 = arith.constant 0 : index
    %c0_4 = arith.constant 0 : index
    %3 = vector.load %arg1[%c0_3, %c0_4] : memref<8x16xf32, #tpu.memory_space<vmem>>, vector<8x16xf32>
    %c0_5 = arith.constant 0 : index
    %c0_6 = arith.constant 0 : index
    %4 = vector.load %arg2[%c0_5, %c0_6] : memref<16x128xf32, #tpu.memory_space<vmem>>, vector<16x128xf32>
    %cst = arith.constant dense<0.000000e+00> : vector<8x128xf32>
    %5 = tpu.matmul %3, %4, %cst {dimension_numbers = #tpu.dot_dimension_numbers<[1], [0], [0], [1], [0, 0, 1, 1], [], []>} : vector<8x16xf32>, vector<16x128xf32>, vector<8x128xf32> -> vector<8x128xf32>
    %6 = vector.broadcast %0 : vector<1x128xf32> to vector<8x128xf32>
    %7 = arith.addf %5, %6 : vector<8x128xf32>
    %cst_7 = arith.constant 0.000000e+00 : f32
    %8 = vector.broadcast %cst_7 : f32 to vector<8x128xf32>
    %9 = arith.maximumf %7, %8 : vector<8x128xf32>
    %c0_8 = arith.constant 0 : index
    %c0_9 = arith.constant 0 : index
    %10 = vector.load %arg3[%c0_8, %c0_9] : memref<128x128xf32, #tpu.memory_space<vmem>>, vector<128x128xf32>
    %cst_10 = arith.constant dense<0.000000e+00> : vector<8x128xf32>
    %11 = tpu.matmul %9, %10, %cst_10 {dimension_numbers = #tpu.dot_dimension_numbers<[1], [0], [0], [1], [0, 0, 1, 1], [], []>} : vector<8x128xf32>, vector<128x128xf32>, vector<8x128xf32> -> vector<8x128xf32>
    %12 = vector.broadcast %1 : vector<1x128xf32> to vector<8x128xf32>
    %13 = arith.addf %11, %12 : vector<8x128xf32>
    %cst_11 = arith.constant 0.000000e+00 : f32
    %14 = vector.broadcast %cst_11 : f32 to vector<8x128xf32>
    %15 = arith.maximumf %13, %14 : vector<8x128xf32>
    %c0_12 = arith.constant 0 : index
    %c0_13 = arith.constant 0 : index
    %16 = vector.load %arg4[%c0_12, %c0_13] : memref<128x4xf32, #tpu.memory_space<vmem>>, vector<128x4xf32>
    %cst_14 = arith.constant dense<0.000000e+00> : vector<8x4xf32>
    %17 = tpu.matmul %15, %16, %cst_14 {dimension_numbers = #tpu.dot_dimension_numbers<[1], [0], [0], [1], [0, 0, 1, 1], [], []>} : vector<8x128xf32>, vector<128x4xf32>, vector<8x4xf32> -> vector<8x4xf32>
    %18 = vector.broadcast %2 : vector<1x4xf32> to vector<8x4xf32>
    %19 = arith.addf %17, %18 : vector<8x4xf32>
    %c0_15 = arith.constant 0 : index
    %c0_16 = arith.constant 0 : index
    %20 = vector.load %arg6[%c0_15, %c0_16] : memref<8x4xf32, #tpu.memory_space<vmem>>, vector<8x4xf32>
    tpu.vector_store %arg6[%c0_15, %c0_16], %19 {strides = array<i32>} : memref<8x4xf32, #tpu.memory_space<vmem>>, vector<8x4xf32>,
    return
  }
  func.func @transform_0(%arg0: i32) -> (i32, i32) {
    %c0_i32 = arith.constant 0 : i32
    %c0_i32_0 = arith.constant 0 : i32
    return %arg0, %c0_i32 : i32, i32
  }
  func.func @transform_1(%arg0: i32) -> (i32, i32) {
    %c0_i32 = arith.constant 0 : i32
    %c0_i32_0 = arith.constant 0 : i32
    %c0_i32_1 = arith.constant 0 : i32
    return %c0_i32, %c0_i32_0 : i32, i32
  }
  func.func @transform_2(%arg0: i32) -> (i32, i32) {
    %c0_i32 = arith.constant 0 : i32
    %c0_i32_0 = arith.constant 0 : i32
    %c0_i32_1 = arith.constant 0 : i32
    return %c0_i32, %c0_i32_0 : i32, i32
  }
  func.func @transform_3(%arg0: i32) -> (i32, i32) {
    %c0_i32 = arith.constant 0 : i32
    %c0_i32_0 = arith.constant 0 : i32
    %c0_i32_1 = arith.constant 0 : i32
    return %c0_i32, %c0_i32_0 : i32, i32
  }
  func.func @transform_4(%arg0: i32) -> (i32, i32) {
    %c0_i32 = arith.constant 0 : i32
    %c0_i32_0 = arith.constant 0 : i32
    %c0_i32_1 = arith.constant 0 : i32
    return %c0_i32, %c0_i32_0 : i32, i32
  }
  func.func @transform_5(%arg0: i32) -> (i32, i32) {
    %c0_i32 = arith.constant 0 : i32
    %c0_i32_0 = arith.constant 0 : i32
    return %arg0, %c0_i32 : i32, i32
  }
}

</mosaic_0001>

<bundles_post_ra>
// kernel: tpu_custom_call.1
= control target key start
LH: loop header
LB: loop body
LE: loop exit
PB: predicated region body
PF: predicated region fallthrough
CT: control target
= control target key end

     0   :  { %10 = vsyncpa [#allocation3], 0  ;;  %s678_s0 = inlined_call_operand.hbm [shape: f32[8,16], index: 0, kind: input, shape index: {}]   ;;  %s679_s1 = inlined_call_operand.hbm [shape: f32[16,128], index: 1, kind: input, shape index: {}]   ;;  %s680_s2 = inlined_call_operand.vmem [shape: f32[128,128], index: 2, kind: input, shape index: {}]   ;;  %s681_s3 = inlined_call_operand.vmem [shape: f32[128,4], index: 3, kind: input, shape index: {}]   ;;  %s682_s4 = inlined_call_operand.vmem [shape: f32[3,128], index: 4, kind: input, shape index: {}]   ;;  %s683_s5 = inlined_call_operand.vmem [shape: f32[8,4], index: 5, kind: output, shape index: {}]  }
   0x1   :  { %11 = vsyncpa [#allocation5], 0  ;;  %s488_s18 = smov [#allocation2]   ;;  %s489_s20 = smov [#allocation4]  }
   0x2   :  { %s18_s19 = sshll.u32 %s488_s18, 4  ;;  %s27_s21 = sshll.u32 %s489_s20, 4  ;;  %s19_s19 = int_to_ptr.vmem [resolvable:$true] %s18_s19  ;;  %s28_s21 = int_to_ptr.vmem [resolvable:$true] %s27_s21 }
   0x3   :  { %s452_s22 = scalar_lea.vmem %s19_s19, 128  ;;  %p457_p1 = scmp.lt.s32.totalorder %s19_s19, %s19_s19 }
   0x4   :  { %p453_p0 = scmp.ne.s32.totalorder %s19_s19, %s452_s22  ;;  %p458_p2 = scmp.lt.s32.totalorder %s452_s22, %s452_s22 }
   0x6   :  { %p459_p3 = por %p458_p2, %p457_p1 }
   0x8   :  { %p460_p4 = pnand %p459_p3, %p453_p0 }
   0xa   :  { %463 = shalt.err (!%p460_p4)
}
   0xb   :  { %21 = dma.hbm_to_vmem [thread:$0]  %s678_s0, 128, %s19_s19, [#allocation3]  }
   0xc   :  { %s472_s25 = scalar_lea.vmem %s28_s21, 256  ;;  %p477_p6 = scmp.lt.s32.totalorder %s28_s21, %s28_s21 }
   0xd   :  { %p473_p5 = scmp.ne.s32.totalorder %s28_s21, %s472_s25  ;;  %p478_p7 = scmp.lt.s32.totalorder %s472_s25, %s472_s25 }
   0xf   :  { %p479_p8 = por %p478_p7, %p477_p6 }
  0x11   :  { %p480_p9 = pnand %p479_p8, %p473_p5 }
  0x13   :  { %483 = shalt.err (!%p480_p9)
}
  0x14   :  { %s490_s26 = smov 128   ;;  %s491_s27 = smov 8  }
  0x15   :  { %33 = dma.hbm_to_vmem [thread:$0]  %s679_s1, 256, %s28_s21, [#allocation5], %s490_s26, %s490_s26, %s491_s27  }
  0x16   :  { %484 = dma.done.wait [#allocation3], 128  }
  0x17   :  { %485 = vsyncadd [#allocation3], 4294967168 }
  0x18   :  { %486 = dma.done.wait [#allocation5], 256  }
  0x19   :  { %487 = vsyncadd [#allocation5], 4294967040  ;;  %v492_v0 = vmov 0.0   ;;  %vm493_vm0 = vmmov 0   ;;  %v51_v1 = vld [vmem:[#allocation4 + $0x8] sm:$0xff]  ;;  %v50_v2 = vld [vmem:[#allocation4] sm:$0xff] }
  0x1a   :  { %361 = vmatprep.subr.mxu0 %v492_v0  ;;  %365 = vmatprep.mubr.msk.f32.mxu0 %vm493_vm0, %v492_v0  ;;  %v49_v3 = vld [vmem:[#allocation2] sm:$0xff]  ;;  %vm56_vm1 = vcmask 130048   ;;  %v146_v4 = vld [vmem:[%s680_s2 + $0x78] sm:$0xff]  ;;  %v145_v5 = vld [vmem:[%s680_s2 + $0x70] sm:$0xff]  ;;  %vm312_vm2 = vcmask 31744  }
  0x1b   :  { %368 = vmatprep.subr.mxu1 %v492_v0  ;;  %400 = vmatprep.mubr.msk.f32.mxu1 %vm493_vm0, %v492_v0  ;;  %v144_v6 = vld [vmem:[%s680_s2 + $0x68] sm:$0xff]  ;;  %v143_v7 = vld [vmem:[%s680_s2 + $0x60] sm:$0xff]  ;;  %v142_v8 = vld [vmem:[%s680_s2 + $0x58] sm:$0xff] }
  0x1c   :  { %362 = vmatpush3.msra.mxu0 %v51_v1  ;;  %369 = vmatpush3.msra.mxu1 %v146_v4  ;;  %v141_v9 = vld [vmem:[%s680_s2 + $0x50] sm:$0xff]  ;;  %v140_v10 = vld [vmem:[%s680_s2 + $0x48] sm:$0xff]  ;;  %v139_v11 = vld [vmem:[%s680_s2 + $0x40] sm:$0xff] }
  0x1d   :  { %363 = vmatprep.subr.mxu0 %v492_v0  ;;  %370 = vmatprep.subr.mxu1 %v492_v0  ;;  %v138_v12 = vld [vmem:[%s680_s2 + $0x38] sm:$0xff]  ;;  %v137_v13 = vld [vmem:[%s680_s2 + $0x30] sm:$0xff]  ;;  %v136_v14 = vld [vmem:[%s680_s2 + $0x28] sm:$0xff] }
  0x1e   :  { %364 = vmatpush3.msra.mxu0 %v50_v2  ;;  %371 = vmatpush3.msra.mxu1 %v145_v5  ;;  %v135_v15 = vld [vmem:[%s680_s2 + $0x20] sm:$0xff]  ;;  %v134_v16 = vld [vmem:[%s680_s2 + $0x18] sm:$0xff]  ;;  %v133_v17 = vld [vmem:[%s680_s2 + $0x10] sm:$0xff] }
  0x1f   :  { %366 = vmatmul.mubr.msk.f32.vlgmr.msra.gmra.mxu0 %vm56_vm1, %v49_v3  ;;  %372 = vmatprep.subr.mxu1 %v492_v0  ;;  %v132_v18 = vld [vmem:[%s680_s2 + $0x8] sm:$0xff]  ;;  %v131_v19 = vld [vmem:[%s680_s2] sm:$0xff]  ;;  %v237_v20 = vld [vmem:[%s681_s3 + $0x78] sm:$0xff] }
  0x20   :  { %403 = vmatprep.subr.mxu0 %v492_v0  ;;  %373 = vmatpush3.msra.mxu1 %v144_v6  ;;  %v236_v21 = vld [vmem:[%s681_s3 + $0x70] sm:$0xff]  ;;  %v235_v22 = vld [vmem:[%s681_s3 + $0x68] sm:$0xff]  ;;  %v234_v23 = vld [vmem:[%s681_s3 + $0x60] sm:$0xff] }
  0x21   :  { %435 = vmatprep.mubr.msk.f32.mxu0 %vm493_vm0, %v492_v0  ;;  %374 = vmatprep.subr.mxu1 %v492_v0  ;;  %v233_v24 = vld [vmem:[%s681_s3 + $0x58] sm:$0xff]  ;;  %v232_v25 = vld [vmem:[%s681_s3 + $0x50] sm:$0xff]  ;;  %v231_v26 = vld [vmem:[%s681_s3 + $0x48] sm:$0xff] }
  0x22   :  { %375 = vmatpush3.msra.mxu1 %v143_v7  ;;  %404 = vmatpush3.msra.mxu0 %v237_v20  ;;  %v230_v27 = vld [vmem:[%s681_s3 + $0x40] sm:$0xff]  ;;  %v229_v28 = vld [vmem:[%s681_s3 + $0x38] sm:$0xff]  ;;  %v228_v29 = vld [vmem:[%s681_s3 + $0x30] sm:$0xff] }
  0x23   :  { %376 = vmatprep.subr.mxu1 %v492_v0  ;;  %405 = vmatprep.subr.mxu0 %v492_v0  ;;  %v227_v30 = vld [vmem:[%s681_s3 + $0x28] sm:$0xff]  ;;  %v226_v31 = vld [vmem:[%s681_s3 + $0x20] sm:$0xff]  ;;  %v225_v32 = vld [vmem:[%s681_s3 + $0x18] sm:$0xff] }
  0x24   :  { %377 = vmatpush3.msra.mxu1 %v142_v8  ;;  %406 = vmatpush3.msra.mxu0 %v236_v21  ;;  %v320_v33 = vld [vmem:[%s682_s4] ss:$0 sm:$0xff]  ;;  %v224_v38 = vld [vmem:[%s681_s3 + $0x10] sm:$0xff]  ;;  %v223_v39 = vld [vmem:[%s681_s3 + $0x8] sm:$0xff] }
  0x25   :  { %378 = vmatprep.subr.mxu1 %v492_v0  ;;  %407 = vmatprep.subr.mxu0 %v492_v0  ;;  %v222_v40 = vld [vmem:[%s681_s3] sm:$0xff] }
  0x26   :  { %379 = vmatpush3.msra.mxu1 %v141_v9  ;;  %408 = vmatpush3.msra.mxu0 %v235_v22  ;;  %v322_v41 = vld [vmem:[%s682_s4 + $0x1] ss:$0 sm:$0xff]  ;;  %v323_v46 = vld [vmem:[%s682_s4 + $0x2] ss:$0 sm:$0xff] }
  0x27   :  { %380 = vmatprep.subr.mxu1 %v492_v0  ;;  %409 = vmatprep.subr.mxu0 %v492_v0 }
  0x28   :  { %381 = vmatpush3.msra.mxu1 %v140_v10  ;;  %410 = vmatpush3.msra.mxu0 %v234_v23 }
  0x29   :  { %382 = vmatprep.subr.mxu1 %v492_v0  ;;  %411 = vmatprep.subr.mxu0 %v492_v0 }
  0x2a   :  { %383 = vmatpush3.msra.mxu1 %v139_v11  ;;  %412 = vmatpush3.msra.mxu0 %v233_v24 }
  0x2b   :  { %384 = vmatprep.subr.mxu1 %v492_v0  ;;  %413 = vmatprep.subr.mxu0 %v492_v0 }
  0x2c   :  { %385 = vmatpush3.msra.mxu1 %v138_v12  ;;  %414 = vmatpush3.msra.mxu0 %v232_v25 }
  0x2d   :  { %386 = vmatprep.subr.mxu1 %v492_v0  ;;  %415 = vmatprep.subr.mxu0 %v492_v0 }
  0x2e   :  { %387 = vmatpush3.msra.mxu1 %v137_v13  ;;  %416 = vmatpush3.msra.mxu0 %v231_v26 }
  0x2f   :  { %388 = vmatprep.subr.mxu1 %v492_v0  ;;  %417 = vmatprep.subr.mxu0 %v492_v0 }
  0x30   :  { %389 = vmatpush3.msra.mxu1 %v136_v14  ;;  %418 = vmatpush3.msra.mxu0 %v230_v27 }
  0x31   :  { %390 = vmatprep.subr.mxu1 %v492_v0  ;;  %419 = vmatprep.subr.mxu0 %v492_v0 }
  0x32   :  { %391 = vmatpush3.msra.mxu1 %v135_v15  ;;  %420 = vmatpush3.msra.mxu0 %v229_v28 }
  0x33   :  { %392 = vmatprep.subr.mxu1 %v492_v0  ;;  %421 = vmatprep.subr.mxu0 %v492_v0 }
  0x34   :  { %393 = vmatpush3.msra.mxu1 %v134_v16  ;;  %422 = vmatpush3.msra.mxu0 %v228_v29 }
  0x35   :  { %394 = vmatprep.subr.mxu1 %v492_v0  ;;  %423 = vmatprep.subr.mxu0 %v492_v0 }
  0x36   :  { %395 = vmatpush3.msra.mxu1 %v133_v17  ;;  %424 = vmatpush3.msra.mxu0 %v227_v30 }
  0x37   :  { %396 = vmatprep.subr.mxu1 %v492_v0  ;;  %425 = vmatprep.subr.mxu0 %v492_v0 }
  0x38   :  { %397 = vmatpush3.msra.mxu1 %v132_v18  ;;  %426 = vmatpush3.msra.mxu0 %v226_v31 }
  0x39   :  { %398 = vmatprep.subr.mxu1 %v492_v0  ;;  %427 = vmatprep.subr.mxu0 %v492_v0 }
  0x3a   :  { %399 = vmatpush3.msra.mxu1 %v131_v19  ;;  %428 = vmatpush3.msra.mxu0 %v225_v32 }
  0x3b   :  { %429 = vmatprep.subr.mxu0 %v492_v0 }
  0x3c   :  { %430 = vmatpush3.msra.mxu0 %v224_v38 }
  0x3d   :  { %431 = vmatprep.subr.mxu0 %v492_v0 }
  0x3e   :  { %432 = vmatpush3.msra.mxu0 %v223_v39 }
  0x3f   :  { %433 = vmatprep.subr.mxu0 %v492_v0 }
  0x40   :  { %434 = vmatpush3.msra.mxu0 %v222_v40 }
  0xdf   :  { %v126_v34 = vpop.f32.mrf.mxu0 }
  0xe0   :  { %v127_v35 = vadd.f32 %v320_v33, %v126_v34 }
  0xe1   :  { %v367_v36 = vpop.f32.mrf.mxu0 }
  0xe2   :  { %v130_v37 = vmax.f32 %v127_v35, 0.0 }
  0xe4   :  { %401 = vmatmul.mubr.f32.vlgmr.msra.gmra.mxu1 %v130_v37 }
 0x1a4   :  { %v217_v42 = vpop.f32.mrf.mxu1 }
 0x1a5   :  { %v218_v43 = vadd.f32 %v322_v41, %v217_v42 }
 0x1a6   :  { %v402_v44 = vpop.f32.mrf.mxu1 }
 0x1a7   :  { %v221_v45 = vmax.f32 %v218_v43, 0.0 }
 0x1a9   :  { %436 = vmatmul.mubr.f32.vlgmr.msra.gmra.mxu0 %v221_v45 }
 0x269   :  { %v308_v47 = vpop.f32.mrf.mxu0 }
 0x26a   :  { %v309_v48 = vadd.f32 %v323_v46, %v308_v47 }
 0x26b   :  { %v437_v49 = vpop.f32.mrf.mxu0 }
 0x26c   :  { %313 = vst.msk [vmem:[%s683_s5] sm:$0xff] %vm312_vm2, %v309_v48 }
 0x26d   :  { %318 = vsyncpa [#allocation3], 1 }
 0x26e   :  { %319 = vsyncpa [#allocation5], 1 }

</bundles_post_ra>
